<compile_context>
chip_gen: v6e
topology: v6e:2x2x1
jax: 0.10.0
libtpu: 0.0.40
codegen_flags: <defaults>
</compile_context>

<pallas_src>
import jax
import jax.numpy as jnp
from jax.experimental import pallas as pl
from jax.experimental.pallas import tpu as pltpu


def _fdr_kernel(x_ref,
                w1_ref, b1_ref,
                w2_ref, b2_ref,
                w3_ref, b3_ref,
                w4_ref, b4_ref,
                out_ref):
    # Layer 1: x @ W1 + b1, f32 accumulation on the MXU, bf16 ReLU.
    z1 = jnp.dot(x_ref[...], w1_ref[...], preferred_element_type=jnp.float32) + b1_ref[...]
    h1 = jnp.maximum(z1.astype(jnp.bfloat16), 0.0)

    # Layer 2
    z2 = jnp.dot(h1, w2_ref[...], preferred_element_type=jnp.float32) + b2_ref[...]
    h2 = jnp.maximum(z2.astype(jnp.bfloat16), 0.0)

    # Layer 3 (FC output "z" in the PyTorch module; no ReLU inside FC)
    z = jnp.dot(h2, w3_ref[...], preferred_element_type=jnp.float32) + b3_ref[...]

    # Output head: Linear(ReLU(z))
    h3 = jnp.maximum(z.astype(jnp.bfloat16), 0.0)
    out = jnp.dot(h3, w4_ref[...], preferred_element_type=jnp.float32) + b4_ref[...]

    # NOTE: out lane width (obs_dim=24) < 128 lowers to a masked store; negligible at this size.
    out_ref[...] = out.astype(out_ref.dtype)


def prepare_params(params):
    """One-time conversion of module params for the kernel (do NOT call per forward).

    params: [(W1,b1),(W2,b2),(W3,b3),(W4,b4)], W: (in,out), b: (1,out), f32.
    Returns a flat tuple: bf16 weights (MXU operands), f32 biases (added to f32 accumulator).
    """
    (w1, b1), (w2, b2), (w3, b3), (w4, b4) = params
    return (w1.astype(jnp.bfloat16), b1.astype(jnp.float32),
            w2.astype(jnp.bfloat16), b2.astype(jnp.float32),
            w3.astype(jnp.bfloat16), b3.astype(jnp.float32),
            w4.astype(jnp.bfloat16), b4.astype(jnp.float32))


def forward_dyn_reg_forward(s, a, prepped, *, tb=None):
    """ForwardDynReg.forward.

    s: (B, obs_dim) f32, a: (B, act_dim) f32.
    prepped: output of prepare_params() (bf16 weights, f32 biases) -- converted once, reused.
    """
    B = s.shape[0]
    w1, b1, w2, b2, w3, b3, w4, b4 = prepped
    in_dim = w1.shape[0]
    out_dim = w4.shape[1]
    assert s.shape[1] + a.shape[1] == in_dim

    # Batch tile: as large as possible (weights are VMEM-resident, so each extra grid step is
    # ~0.35 us of pure overhead). Even tb=1024 keeps the whole footprint < 2 MB of VMEM.
    if tb is None:
        tb = min(B, 512)
    assert B % tb == 0, "pad B to a multiple of tb"
    assert tb % 16 == 0 or tb == B, "bf16 sublane packing: use a multiple of 16 rows (or tb == B)"

    # Concat once in the wrapper (tiny op) and cast activations to bf16 for the MXU.
    x = jnp.concatenate([s, a], axis=1).astype(jnp.bfloat16)

    grid_steps = B // tb
    grid = (grid_steps,)

    # Dual-TC sharding only pays off when each core gets a meaningful amount of batch.
    parallel = grid_steps > 1 and (B // 2) >= 256
    semantics = ("parallel",) if parallel else ("arbitrary",)

    def const_spec(arr):
        # weights/biases: same block every grid step -> DMA'd into VMEM once, stays resident
        return pl.BlockSpec(arr.shape, lambda i: (0, 0))

    in_specs = [
        pl.BlockSpec((tb, in_dim), lambda i: (i, 0)),   # batch-tiled activation
        const_spec(w1), const_spec(b1),
        const_spec(w2), const_spec(b2),
        const_spec(w3), const_spec(b3),
        const_spec(w4), const_spec(b4),
    ]

    return pl.pallas_call(
        _fdr_kernel,
        out_shape=jax.ShapeDtypeStruct((B, out_dim), jnp.float32),
        grid=grid,
        in_specs=in_specs,
        out_specs=pl.BlockSpec((tb, out_dim), lambda i: (i, 0)),
        compiler_params=pltpu.CompilerParams(dimension_semantics=semantics),
    )(x, w1, b1, w2, b2, w3, b3, w4, b4)


def make_params(key, obs_dim, act_dim, hidden):
    """Synthetic params matching ForwardDynReg layer shapes (nn.Linear-style init)."""
    in_dim = obs_dim + act_dim
    dims = [(in_dim, hidden), (hidden, hidden), (hidden, hidden), (hidden, obs_dim)]
    params = []
    for din, dout in dims:
        kw, kb, key = jax.random.split(key, 3)
        scale = 1.0 / jnp.sqrt(jnp.float32(din))
        w = jax.random.uniform(kw, (din, dout), jnp.float32, -scale, scale)
        b = jax.random.uniform(kb, (1, dout), jnp.float32, -scale, scale)
        params.append((w, b))
    return params


def reference_forward(s, a, params, *, mirror_bf16):
    """Pure-JAX reference. mirror_bf16=True replicates the kernel's bf16 operand casts."""
    (w1, b1), (w2, b2), (w3, b3), (w4, b4) = params

    def cast(t):
        return t.astype(jnp.bfloat16).astype(jnp.float32) if mirror_bf16 else t

    x = cast(jnp.concatenate([s, a], axis=1))
    h = jnp.maximum(jnp.dot(x, cast(w1)) + b1, 0.0)
    h = jnp.maximum(jnp.dot(cast(h), cast(w2)) + b2, 0.0)
    z = jnp.dot(cast(h), cast(w3)) + b3
    out = jnp.dot(cast(jnp.maximum(z, 0.0)), cast(w4)) + b4
    return out


if __name__ == "__main__":
    key = jax.random.PRNGKey(0)

    B = 128        # batch; tb defaults to min(B, 512) = 128 -> single grid step
    OBS = 24       # observation_space
    ACT = 8        # action_space.shape[0]
    HIDDEN = 256   # hidden_size

    ks, ka, kp = jax.random.split(key, 3)
    s = jax.random.normal(ks, (B, OBS), jnp.float32)
    a = jax.random.normal(ka, (B, ACT), jnp.float32)
    params = make_params(kp, OBS, ACT, HIDDEN)

    # One-time param prep (hoisted bf16 weight casts); reuse across forward calls.
    prepped = prepare_params(params)

    out = forward_dyn_reg_forward(s, a, prepped)
    out = jax.block_until_ready(out)

    ref_bf16 = reference_forward(s, a, params, mirror_bf16=True)   # same numerics as kernel
    ref_f32 = reference_forward(s, a, params, mirror_bf16=False)   # true module (f32) semantics

    assert out.shape == (B, OBS)
    assert jnp.allclose(out, ref_bf16, atol=1e-2, rtol=1e-2), "mismatch vs bf16-mirrored reference"
    assert jnp.allclose(out, ref_f32, atol=5e-2, rtol=5e-2), "mismatch vs f32 reference (bf16 tolerance)"

    print("KERNEL_OK")
</pallas_src>

<mosaic_0001>
module attributes {stable_mosaic.version = 11 : i64} {
  func.func @_fdr_kernel(%arg0: i32, %arg1: memref<128x32xbf16, #tpu.memory_space<vmem>>, %arg2: memref<32x256xbf16, #tpu.memory_space<vmem>>, %arg3: memref<1x256xf32, #tpu.memory_space<vmem>>, %arg4: memref<256x256xbf16, #tpu.memory_space<vmem>>, %arg5: memref<1x256xf32, #tpu.memory_space<vmem>>, %arg6: memref<256x256xbf16, #tpu.memory_space<vmem>>, %arg7: memref<1x256xf32, #tpu.memory_space<vmem>>, %arg8: memref<256x24xbf16, #tpu.memory_space<vmem>>, %arg9: memref<1x24xf32, #tpu.memory_space<vmem>>, %arg10: memref<128x24xf32, #tpu.memory_space<vmem>>) attributes {dimension_semantics = [#tpu.dimension_semantics<arbitrary>], iteration_bounds = array<i64: 1>, scalar_prefetch = 0 : i64, scratch_operands = 0 : i64, tpu.core_type = #tpu.core_type<tc>, window_params = [{transform_indices = @transform_0, window_bounds = array<i64: 128, 32>}, {pipeline_mode = #tpu.pipeline_mode<synchronous>, transform_indices = @transform_1, window_bounds = array<i64: 32, 256>}, {pipeline_mode = #tpu.pipeline_mode<synchronous>, transform_indices = @transform_2, window_bounds = array<i64: 1, 256>}, {pipeline_mode = #tpu.pipeline_mode<synchronous>, transform_indices = @transform_3, window_bounds = array<i64: 256, 256>}, {pipeline_mode = #tpu.pipeline_mode<synchronous>, transform_indices = @transform_4, window_bounds = array<i64: 1, 256>}, {pipeline_mode = #tpu.pipeline_mode<synchronous>, transform_indices = @transform_5, window_bounds = array<i64: 256, 256>}, {pipeline_mode = #tpu.pipeline_mode<synchronous>, transform_indices = @transform_6, window_bounds = array<i64: 1, 256>}, {pipeline_mode = #tpu.pipeline_mode<synchronous>, transform_indices = @transform_7, window_bounds = array<i64: 256, 24>}, {pipeline_mode = #tpu.pipeline_mode<synchronous>, transform_indices = @transform_8, window_bounds = array<i64: 1, 24>}, {transform_indices = @transform_9, window_bounds = array<i64: 128, 24>}]} {
    %c0 = arith.constant 0 : index
    %c0_0 = arith.constant 0 : index
    %0 = vector.load %arg1[%c0, %c0_0] : memref<128x32xbf16, #tpu.memory_space<vmem>>, vector<128x32xbf16>
    %c0_1 = arith.constant 0 : index
    %c0_2 = arith.constant 0 : index
    %1 = vector.load %arg2[%c0_1, %c0_2] : memref<32x256xbf16, #tpu.memory_space<vmem>>, vector<32x256xbf16>
    %cst = arith.constant dense<0.000000e+00> : vector<128x256xf32>
    %2 = tpu.matmul %0, %1, %cst {dimension_numbers = #tpu.dot_dimension_numbers<[1], [0], [0], [1], [0, 0, 1, 1], [], []>} : vector<128x32xbf16>, vector<32x256xbf16>, vector<128x256xf32> -> vector<128x256xf32>
    %c0_3 = arith.constant 0 : index
    %c0_4 = arith.constant 0 : index
    %3 = vector.load %arg3[%c0_3, %c0_4] : memref<1x256xf32, #tpu.memory_space<vmem>>, vector<1x256xf32>
    %4 = vector.broadcast %3 : vector<1x256xf32> to vector<128x256xf32>
    %5 = arith.addf %2, %4 : vector<128x256xf32>
    %6 = arith.truncf %5 : vector<128x256xf32> to vector<128x256xbf16>
    %cst_5 = arith.constant 0.000000e+00 : bf16
    %7 = vector.broadcast %cst_5 : bf16 to vector<128x256xbf16>
    %8 = arith.maximumf %6, %7 : vector<128x256xbf16>
    %c0_6 = arith.constant 0 : index
    %c0_7 = arith.constant 0 : index
    %9 = vector.load %arg4[%c0_6, %c0_7] : memref<256x256xbf16, #tpu.memory_space<vmem>>, vector<256x256xbf16>
    %cst_8 = arith.constant dense<0.000000e+00> : vector<128x256xf32>
    %10 = tpu.matmul %8, %9, %cst_8 {dimension_numbers = #tpu.dot_dimension_numbers<[1], [0], [0], [1], [0, 0, 1, 1], [], []>} : vector<128x256xbf16>, vector<256x256xbf16>, vector<128x256xf32> -> vector<128x256xf32>
    %c0_9 = arith.constant 0 : index
    %c0_10 = arith.constant 0 : index
    %11 = vector.load %arg5[%c0_9, %c0_10] : memref<1x256xf32, #tpu.memory_space<vmem>>, vector<1x256xf32>
    %12 = vector.broadcast %11 : vector<1x256xf32> to vector<128x256xf32>
    %13 = arith.addf %10, %12 : vector<128x256xf32>
    %14 = arith.truncf %13 : vector<128x256xf32> to vector<128x256xbf16>
    %cst_11 = arith.constant 0.000000e+00 : bf16
    %15 = vector.broadcast %cst_11 : bf16 to vector<128x256xbf16>
    %16 = arith.maximumf %14, %15 : vector<128x256xbf16>
    %c0_12 = arith.constant 0 : index
    %c0_13 = arith.constant 0 : index
    %17 = vector.load %arg6[%c0_12, %c0_13] : memref<256x256xbf16, #tpu.memory_space<vmem>>, vector<256x256xbf16>
    %cst_14 = arith.constant dense<0.000000e+00> : vector<128x256xf32>
    %18 = tpu.matmul %16, %17, %cst_14 {dimension_numbers = #tpu.dot_dimension_numbers<[1], [0], [0], [1], [0, 0, 1, 1], [], []>} : vector<128x256xbf16>, vector<256x256xbf16>, vector<128x256xf32> -> vector<128x256xf32>
    %c0_15 = arith.constant 0 : index
    %c0_16 = arith.constant 0 : index
    %19 = vector.load %arg7[%c0_15, %c0_16] : memref<1x256xf32, #tpu.memory_space<vmem>>, vector<1x256xf32>
    %20 = vector.broadcast %19 : vector<1x256xf32> to vector<128x256xf32>
    %21 = arith.addf %18, %20 : vector<128x256xf32>
    %22 = arith.truncf %21 : vector<128x256xf32> to vector<128x256xbf16>
    %cst_17 = arith.constant 0.000000e+00 : bf16
    %23 = vector.broadcast %cst_17 : bf16 to vector<128x256xbf16>
    %24 = arith.maximumf %22, %23 : vector<128x256xbf16>
    %c0_18 = arith.constant 0 : index
    %c0_19 = arith.constant 0 : index
    %25 = vector.load %arg8[%c0_18, %c0_19] : memref<256x24xbf16, #tpu.memory_space<vmem>>, vector<256x24xbf16>
    %cst_20 = arith.constant dense<0.000000e+00> : vector<128x24xf32>
    %26 = tpu.matmul %24, %25, %cst_20 {dimension_numbers = #tpu.dot_dimension_numbers<[1], [0], [0], [1], [0, 0, 1, 1], [], []>} : vector<128x256xbf16>, vector<256x24xbf16>, vector<128x24xf32> -> vector<128x24xf32>
    %c0_21 = arith.constant 0 : index
    %c0_22 = arith.constant 0 : index
    %27 = vector.load %arg9[%c0_21, %c0_22] : memref<1x24xf32, #tpu.memory_space<vmem>>, vector<1x24xf32>
    %28 = vector.broadcast %27 : vector<1x24xf32> to vector<128x24xf32>
    %29 = arith.addf %26, %28 : vector<128x24xf32>
    %c0_23 = arith.constant 0 : index
    %c0_24 = arith.constant 0 : index
    %30 = vector.load %arg10[%c0_23, %c0_24] : memref<128x24xf32, #tpu.memory_space<vmem>>, vector<128x24xf32>
    tpu.vector_store %arg10[%c0_23, %c0_24], %29 {strides = array<i32>} : memref<128x24xf32, #tpu.memory_space<vmem>>, vector<128x24xf32>,
    return
  }
  func.func @transform_0(%arg0: i32) -> (i32, i32) {
    %c0_i32 = arith.constant 0 : i32
    %c0_i32_0 = arith.constant 0 : i32
    return %arg0, %c0_i32 : i32, i32
  }
  func.func @transform_1(%arg0: i32) -> (i32, i32) {
    %c0_i32 = arith.constant 0 : i32
    %c0_i32_0 = arith.constant 0 : i32
    %c0_i32_1 = arith.constant 0 : i32
    return %c0_i32, %c0_i32_0 : i32, i32
  }
  func.func @transform_2(%arg0: i32) -> (i32, i32) {
    %c0_i32 = arith.constant 0 : i32
    %c0_i32_0 = arith.constant 0 : i32
    %c0_i32_1 = arith.constant 0 : i32
    return %c0_i32, %c0_i32_0 : i32, i32
  }
  func.func @transform_3(%arg0: i32) -> (i32, i32) {
    %c0_i32 = arith.constant 0 : i32
    %c0_i32_0 = arith.constant 0 : i32
    %c0_i32_1 = arith.constant 0 : i32
    return %c0_i32, %c0_i32_0 : i32, i32
  }
  func.func @transform_4(%arg0: i32) -> (i32, i32) {
    %c0_i32 = arith.constant 0 : i32
    %c0_i32_0 = arith.constant 0 : i32
    %c0_i32_1 = arith.constant 0 : i32
    return %c0_i32, %c0_i32_0 : i32, i32
  }
  func.func @transform_5(%arg0: i32) -> (i32, i32) {
    %c0_i32 = arith.constant 0 : i32
    %c0_i32_0 = arith.constant 0 : i32
    %c0_i32_1 = arith.constant 0 : i32
    return %c0_i32, %c0_i32_0 : i32, i32
  }
  func.func @transform_6(%arg0: i32) -> (i32, i32) {
    %c0_i32 = arith.constant 0 : i32
    %c0_i32_0 = arith.constant 0 : i32
    %c0_i32_1 = arith.constant 0 : i32
    return %c0_i32, %c0_i32_0 : i32, i32
  }
  func.func @transform_7(%arg0: i32) -> (i32, i32) {
    %c0_i32 = arith.constant 0 : i32
    %c0_i32_0 = arith.constant 0 : i32
    %c0_i32_1 = arith.constant 0 : i32
    return %c0_i32, %c0_i32_0 : i32, i32
  }
  func.func @transform_8(%arg0: i32) -> (i32, i32) {
    %c0_i32 = arith.constant 0 : i32
    %c0_i32_0 = arith.constant 0 : i32
    %c0_i32_1 = arith.constant 0 : i32
    return %c0_i32, %c0_i32_0 : i32, i32
  }
  func.func @transform_9(%arg0: i32) -> (i32, i32) {
    %c0_i32 = arith.constant 0 : i32
    %c0_i32_0 = arith.constant 0 : i32
    return %arg0, %c0_i32 : i32, i32
  }
}

</mosaic_0001>

<bundles_post_ra>
// kernel: tpu_custom_call.1
= control target key start
LH: loop header
LB: loop body
LE: loop exit
PB: predicated region body
PF: predicated region fallthrough
CT: control target
= control target key end

     0   :  { %14 = vsyncpa [#allocation3], 0  ;;  %s2057_s0 = inlined_call_operand.vmem [shape: bf16[128,32], index: 0, kind: input, shape index: {}]   ;;  %s2058_s1 = inlined_call_operand.vmem [shape: bf16[32,256], index: 1, kind: input, shape index: {}]   ;;  %s2059_s2 = inlined_call_operand.vmem [shape: f32[1,256], index: 2, kind: input, shape index: {}]   ;;  %s2060_s3 = inlined_call_operand.hbm [shape: bf16[256,256], index: 3, kind: input, shape index: {}]   ;;  %s2061_s4 = inlined_call_operand.vmem [shape: f32[1,256], index: 4, kind: input, shape index: {}]   ;;  %s2062_s5 = inlined_call_operand.hbm [shape: bf16[256,256], index: 5, kind: input, shape index: {}]   ;;  %s2063_s6 = inlined_call_operand.vmem [shape: f32[1,256], index: 6, kind: input, shape index: {}]   ;;  %s2064_s7 = inlined_call_operand.vmem [shape: bf16[256,24], index: 7, kind: input, shape index: {}]   ;;  %s2065_s8 = inlined_call_operand.vmem [shape: f32[1,24], index: 8, kind: input, shape index: {}]   ;;  %s2066_s9 = inlined_call_operand.vmem [shape: f32[128,24], index: 9, kind: output, shape index: {}]  }
   0x1   :  { %15 = vsyncpa [#allocation5], 0  ;;  %s1632_s30 = smov [#allocation2]  }
   0x2   :  { %s27_s10 = sshll.u32 %s1632_s30, 4  ;;  %s28_s10 = int_to_ptr.vmem [resolvable:$true] %s27_s10 }
   0x3   :  { %s1596_s11 = scalar_lea.vmem %s28_s10, 4096  ;;  %p1601_p1 = scmp.lt.s32.totalorder %s28_s10, %s28_s10 }
   0x4   :  { %p1597_p0 = scmp.ne.s32.totalorder %s28_s10, %s1596_s11  ;;  %p1602_p2 = scmp.lt.s32.totalorder %s1596_s11, %s1596_s11 }
   0x6   :  { %p1603_p3 = por %p1602_p2, %p1601_p1 }
   0x8   :  { %p1604_p4 = pnand %p1603_p3, %p1597_p0 }
   0xa   :  { %1607 = shalt.err (!%p1604_p4)
}
   0xb   :  { %s1633_s12 = smov 128   ;;  %s1634_s13 = smov 8  }
   0xc   :  { %33 = dma.hbm_to_vmem [thread:$0]  %s2060_s3, 4096, %s28_s10, [#allocation3], %s1633_s12, %s1633_s12, %s1634_s13  }
   0xd   :  { %s1635_s16 = smov [#allocation4]  }
   0xe   :  { %s41_s17 = sshll.u32 %s1635_s16, 4  ;;  %s42_s17 = int_to_ptr.vmem [resolvable:$true] %s41_s17 }
   0xf   :  { %s1616_s18 = scalar_lea.vmem %s42_s17, 4096  ;;  %p1621_p6 = scmp.lt.s32.totalorder %s42_s17, %s42_s17 }
  0x10   :  { %p1617_p5 = scmp.ne.s32.totalorder %s42_s17, %s1616_s18  ;;  %p1622_p7 = scmp.lt.s32.totalorder %s1616_s18, %s1616_s18 }
  0x12   :  { %p1623_p8 = por %p1622_p7, %p1621_p6 }
  0x14   :  { %p1624_p9 = pnand %p1623_p8, %p1617_p5 }
  0x16   :  { %1627 = shalt.err (!%p1624_p9)
}
  0x17   :  { %47 = dma.hbm_to_vmem [thread:$0]  %s2062_s5, 4096, %s42_s17, [#allocation5], %s1633_s12, %s1633_s12, %s1634_s13  }
  0x18   :  { %1628 = dma.done.wait [#allocation3], 4096  }
  0x19   :  { %1629 = vsyncadd [#allocation3], 4294963200 }
  0x1a   :  { %1630 = dma.done.wait [#allocation5], 4096  }
  0x1b   :  { %1631 = vsyncadd [#allocation5], 4294963200  ;;  %v1636_v0 = vmov 0   ;;  %v1462_v1 = vld [vmem:[%s2058_s1 + $0x14] ss:$8 sps:$4 sm:$0xff]   ;;  %v1468_v5 = vld [vmem:[%s2057_s0] sm:$0xff]  }
  0x1c   :  { %210 = vmatprep.mubr.bf16.mxu0 %v1636_v0  ;;  %v1464_v2 = vld [vmem:[%s2058_s1 + $0x10] ss:$8 sps:$4 sm:$0xff]   ;;  %190 = vmatprep.subr.bf16.mxu0 %v1462_v1  ;;  %v1465_v3 = vld [vmem:[%s2058_s1 + $0x4] ss:$8 sps:$4 sm:$0xff]   ;;  %v1467_v4 = vld [vmem:[%s2058_s1] ss:$8 sps:$4 sm:$0xff]  }
  0x1d   :  { %191 = vmatpush1.bf16.msra.mxu0 %v1464_v2  ;;  %vm153_vm0 = vcmask 261120   ;;  %v1476_v6 = vld [vmem:[#allocation2 + $0x74] ss:$8 sps:$4 sm:$0xff]   ;;  %v1478_v7 = vld [vmem:[#allocation2 + $0x70] ss:$8 sps:$4 sm:$0xff]   ;;  %v1469_v9 = vld [vmem:[%s2057_s0 + $0x8] sm:$0xff]  }
  0x1e   :  { %192 = vmatprep.subr.bf16.mxu0 %v1465_v3  ;;  %v1479_v8 = vld [vmem:[#allocation2 + $0x64] ss:$8 sps:$4 sm:$0xff]   ;;  %527 = vmatprep.subr.bf16.mxu1 %v1476_v6  ;;  %v1481_v10 = vld [vmem:[#allocation2 + $0x60] ss:$8 sps:$4 sm:$0xff]   ;;  %v1482_v11 = vld [vmem:[#allocation2 + $0x54] ss:$8 sps:$4 sm:$0xff]  }
  0x1f   :  { %528 = vmatpush1.bf16.msra.mxu1 %v1478_v7  ;;  %v1484_v12 = vld [vmem:[#allocation2 + $0x50] ss:$8 sps:$4 sm:$0xff]   ;;  %v1485_v13 = vld [vmem:[#allocation2 + $0x44] ss:$8 sps:$4 sm:$0xff]   ;;  %v1487_v15 = vld [vmem:[#allocation2 + $0x40] ss:$8 sps:$4 sm:$0xff]  }
  0x20   :  { %529 = vmatprep.subr.bf16.mxu1 %v1479_v8  ;;  %v1470_v14 = vld [vmem:[%s2057_s0 + $0x10] sm:$0xff]   ;;  %v1491_v18 = vld [vmem:[#allocation2 + $0x24] ss:$8 sps:$4 sm:$0xff]   ;;  %v1471_v19 = vld [vmem:[%s2057_s0 + $0x18] sm:$0xff]   ;;  %v83_v8 = vlaneseq  ;;  %vm1253_vm1 = vcmask 195584  }
  0x21   :  { %193 = vmatpush1.bf16.msra.mxu0 %v1467_v4  ;;  %v1488_v16 = vld [vmem:[#allocation2 + $0x34] ss:$8 sps:$4 sm:$0xff]   ;;  %v1490_v17 = vld [vmem:[#allocation2 + $0x30] ss:$8 sps:$4 sm:$0xff]   ;;  %v1493_v20 = vld [vmem:[#allocation2 + $0x20] ss:$8 sps:$4 sm:$0xff]  }
  0x22   :  { %v1494_v21 = vld [vmem:[#allocation2 + $0x14] ss:$8 sps:$4 sm:$0xff]   ;;  %v1496_v22 = vld [vmem:[#allocation2 + $0x10] ss:$8 sps:$4 sm:$0xff]   ;;  %v1497_v23 = vld [vmem:[#allocation2 + $0x4] ss:$8 sps:$4 sm:$0xff]  }
  0x23   :  { %530 = vmatpush1.bf16.msra.mxu1 %v1481_v10  ;;  %v1472_v24 = vld [vmem:[%s2057_s0 + $0x20] sm:$0xff]   ;;  %v1500_v26 = vld [vmem:[#allocation2 + $0xf4] ss:$8 sps:$4 sm:$0xff]   ;;  %v1502_v27 = vld [vmem:[#allocation2 + $0xf0] ss:$8 sps:$4 sm:$0xff]  }
  0x24   :  { %1288 = vmatmul.mubr.msk.bf16.vlgmr.msra.gmra.mxu0 %vm153_vm0, %v1468_v5  ;;  %531 = vmatprep.subr.bf16.mxu1 %v1482_v11  ;;  %v1499_v25 = vld [vmem:[#allocation2] ss:$8 sps:$4 sm:$0xff]   ;;  %v1503_v28 = vld [vmem:[#allocation2 + $0xe4] ss:$8 sps:$4 sm:$0xff]   ;;  %v1506_v31 = vld [vmem:[#allocation2 + $0xd4] ss:$8 sps:$4 sm:$0xff]  }
  0x25   :  { %220 = vmatprep.mubr.bf16.mxu0 %v1636_v0  ;;  %v1473_v29 = vld [vmem:[%s2057_s0 + $0x28] sm:$0xff]   ;;  %v1508_v32 = vld [vmem:[#allocation2 + $0xd0] ss:$8 sps:$4 sm:$0xff]   ;;  %v1512_v36 = vld [vmem:[#allocation2 + $0xb4] ss:$8 sps:$4 sm:$0xff]  }
  0x26   :  { %v1505_v30 = vld [vmem:[#allocation2 + $0xe0] ss:$8 sps:$4 sm:$0xff]   ;;  %v1509_v33 = vld [vmem:[#allocation2 + $0xc4] ss:$8 sps:$4 sm:$0xff]   ;;  %v1474_v34 = vld [vmem:[%s2057_s0 + $0x30] sm:$0xff]  }
  0x27   :  { %532 = vmatpush1.bf16.msra.mxu1 %v1484_v12  ;;  %v1511_v35 = vld [vmem:[#allocation2 + $0xc0] ss:$8 sps:$4 sm:$0xff]   ;;  %v1514_v37 = vld [vmem:[#allocation2 + $0xb0] ss:$8 sps:$4 sm:$0xff]   ;;  %v1515_v39 = vld [vmem:[#allocation2 + $0xa4] ss:$8 sps:$4 sm:$0xff]  }
  0x28   :  { %533 = vmatprep.subr.bf16.mxu1 %v1485_v13  ;;  %v1475_v38 = vld [vmem:[%s2057_s0 + $0x38] sm:$0xff]   ;;  %v1517_v40 = vld [vmem:[#allocation2 + $0xa0] ss:$8 sps:$4 sm:$0xff]   ;;  %v1521_v43 = vld [vmem:[#allocation2 + $0x84] ss:$8 sps:$4 sm:$0xff]  }
  0x29   :  { %v1518_v41 = vld [vmem:[#allocation2 + $0x94] ss:$8 sps:$4 sm:$0xff]   ;;  %v1520_v42 = vld [vmem:[#allocation2 + $0x90] ss:$8 sps:$4 sm:$0xff]   ;;  %v1523_v44 = vld [vmem:[#allocation2 + $0x80] ss:$8 sps:$4 sm:$0xff]  }
  0x2a   :  { %v1524_v45 = vld [vmem:[#allocation4 + $0x70] ss:$8 sps:$4 sm:$0xff]   ;;  %v1526_v46 = vld [vmem:[#allocation4 + $0x74] ss:$8 sps:$4 sm:$0xff]   ;;  %v1529_v47 = vld [vmem:[#allocation4 + $0x64] ss:$8 sps:$4 sm:$0xff]  }
  0x2b   :  { %534 = vmatpush1.bf16.msra.mxu1 %v1487_v15  ;;  %876 = vmatprep.subr.bf16.mxu0 %v1526_v46  ;;  %v1527_v48 = vld [vmem:[#allocation4 + $0x60] ss:$8 sps:$4 sm:$0xff]   ;;  %v1532_v49 = vld [vmem:[#allocation4 + $0x54] ss:$8 sps:$4 sm:$0xff]   ;;  %v1530_v50 = vld [vmem:[#allocation4 + $0x50] ss:$8 sps:$4 sm:$0xff]  }
  0x2c   :  { %1289 = vmatmul.mubr.msk.bf16.gmra.mxu0 %vm153_vm0, %v1469_v9  ;;  %535 = vmatprep.subr.bf16.mxu1 %v1488_v16  ;;  %v1535_v51 = vld [vmem:[#allocation4 + $0x44] ss:$8 sps:$4 sm:$0xff]   ;;  %v1533_v52 = vld [vmem:[#allocation4 + $0x40] ss:$8 sps:$4 sm:$0xff]   ;;  %v1538_v53 = vld [vmem:[#allocation4 + $0x34] ss:$8 sps:$4 sm:$0xff]  }
  0x2d   :  { %230 = vmatprep.mubr.bf16.mxu0 %v1636_v0  ;;  %877 = vmatpush1.bf16.msra.mxu0 %v1524_v45  ;;  %v1536_v54 = vld [vmem:[#allocation4 + $0x30] ss:$8 sps:$4 sm:$0xff]   ;;  %v1541_v55 = vld [vmem:[#allocation4 + $0x24] ss:$8 sps:$4 sm:$0xff]   ;;  %v1539_v56 = vld [vmem:[#allocation4 + $0x20] ss:$8 sps:$4 sm:$0xff]  }
  0x2e   :  { %878 = vmatprep.subr.bf16.mxu0 %v1529_v47  ;;  %v1544_v57 = vld [vmem:[#allocation4 + $0x14] ss:$8 sps:$4 sm:$0xff]   ;;  %v1542_v58 = vld [vmem:[#allocation4 + $0x10] ss:$8 sps:$4 sm:$0xff]   ;;  %v1547_v59 = vld [vmem:[#allocation4 + $0x4] ss:$8 sps:$4 sm:$0xff]  }
  0x2f   :  { %536 = vmatpush1.bf16.msra.mxu1 %v1490_v17  ;;  %v1545_v60 = vld [vmem:[#allocation4] ss:$8 sps:$4 sm:$0xff]   ;;  %v1550_v61 = vld [vmem:[#allocation4 + $0xf4] ss:$8 sps:$4 sm:$0xff]   ;;  %v1548_v62 = vld [vmem:[#allocation4 + $0xf0] ss:$8 sps:$4 sm:$0xff]  }
  0x30   :  { %537 = vmatprep.subr.bf16.mxu1 %v1491_v18  ;;  %v1553_v63 = vld [vmem:[#allocation4 + $0xe4] ss:$8 sps:$4 sm:$0xff]   ;;  %v1551_v1 = vld [vmem:[#allocation4 + $0xe0] ss:$8 sps:$4 sm:$0xff]   ;;  %v1556_v2 = vld [vmem:[#allocation4 + $0xd4] ss:$8 sps:$4 sm:$0xff]  }
  0x31   :  { %879 = vmatpush1.bf16.msra.mxu0 %v1527_v48  ;;  %v1554_v3 = vld [vmem:[#allocation4 + $0xd0] ss:$8 sps:$4 sm:$0xff]   ;;  %v1559_v4 = vld [vmem:[#allocation4 + $0xc4] ss:$8 sps:$4 sm:$0xff]   ;;  %v1557_v5 = vld [vmem:[#allocation4 + $0xc0] ss:$8 sps:$4 sm:$0xff]  }
  0x32   :  { %880 = vmatprep.subr.bf16.mxu0 %v1532_v49  ;;  %v1562_v6 = vld [vmem:[#allocation4 + $0xb4] ss:$8 sps:$4 sm:$0xff]   ;;  %v1560_v7 = vld [vmem:[#allocation4 + $0xb0] ss:$8 sps:$4 sm:$0xff]   ;;  %v84_v9 = vshrl.u32 %v83_v8, 7 }
  0x33   :  { %538 = vmatpush1.bf16.msra.mxu1 %v1493_v20  ;;  %v81_v11 = vld [vmem:[%s2059_s2] sm:$0x3] }
  0x34   :  { %1290 = vmatmul.mubr.msk.bf16.gmra.mxu0 %vm153_vm0, %v1470_v14  ;;  %539 = vmatprep.subr.bf16.mxu1 %v1494_v21  ;;  %v1745_v10 = vsub.s32 0, %v84_v9  ;;  %v1750_v12 = vsub.s32 1, %v84_v9 }
  0x35   :  { %240 = vmatprep.mubr.bf16.mxu0 %v1636_v0  ;;  %881 = vmatpush1.bf16.msra.mxu0 %v1530_v50 }
  0x36   :  { %882 = vmatprep.subr.bf16.mxu0 %v1535_v51  ;;  %v1753_v14 = vrot.slane %v81_v11, %v1745_v10  ;;  %v1756_v16 = vrot.slane %v81_v11, %v1750_v12 }
  0x37   :  { %540 = vmatpush1.bf16.msra.mxu1 %v1496_v22 }
  0x38   :  { %541 = vmatprep.subr.bf16.mxu1 %v1497_v23 }
  0x39   :  { %883 = vmatpush1.bf16.msra.mxu0 %v1533_v52 }
  0x3a   :  { %884 = vmatprep.subr.bf16.mxu0 %v1538_v53 }
  0x3b   :  { %542 = vmatpush1.bf16.msra.mxu1 %v1499_v25 }
  0x3c   :  { %1291 = vmatmul.mubr.msk.bf16.gmra.mxu0 %vm153_vm0, %v1471_v19  ;;  %543 = vmatprep.subr.bf16.mxu1 %v1500_v26 }
  0x3d   :  { %250 = vmatprep.mubr.bf16.mxu0 %v1636_v0  ;;  %885 = vmatpush1.bf16.msra.mxu0 %v1536_v54 }
  0x3e   :  { %886 = vmatprep.subr.bf16.mxu0 %v1541_v55 }
  0x3f   :  { %544 = vmatpush2.bf16.msra.mxu1 %v1502_v27 }
  0x40   :  { %545 = vmatprep.subr.bf16.mxu1 %v1503_v28 }
  0x41   :  { %887 = vmatpush1.bf16.msra.mxu0 %v1539_v56 }
  0x42   :  { %888 = vmatprep.subr.bf16.mxu0 %v1544_v57 }
  0x43   :  { %546 = vmatpush2.bf16.msra.mxu1 %v1505_v30 }
  0x44   :  { %1292 = vmatmul.mubr.msk.bf16.gmra.mxu0 %vm153_vm0, %v1472_v24  ;;  %547 = vmatprep.subr.bf16.mxu1 %v1506_v31 }
  0x45   :  { %260 = vmatprep.mubr.bf16.mxu0 %v1636_v0  ;;  %889 = vmatpush1.bf16.msra.mxu0 %v1542_v58 }
  0x46   :  { %890 = vmatprep.subr.bf16.mxu0 %v1547_v59 }
  0x47   :  { %548 = vmatpush2.bf16.msra.mxu1 %v1508_v32 }
  0x48   :  { %549 = vmatprep.subr.bf16.mxu1 %v1509_v33 }
  0x49   :  { %891 = vmatpush1.bf16.msra.mxu0 %v1545_v60 }
  0x4a   :  { %892 = vmatprep.subr.bf16.mxu0 %v1550_v61 }
  0x4b   :  { %550 = vmatpush2.bf16.msra.mxu1 %v1511_v35 }
  0x4c   :  { %1293 = vmatmul.mubr.msk.bf16.gmra.mxu0 %vm153_vm0, %v1473_v29  ;;  %551 = vmatprep.subr.bf16.mxu1 %v1512_v36 }
  0x4d   :  { %270 = vmatprep.mubr.bf16.mxu0 %v1636_v0  ;;  %893 = vmatpush2.bf16.msra.mxu0 %v1548_v62 }
  0x4e   :  { %894 = vmatprep.subr.bf16.mxu0 %v1553_v63 }
  0x4f   :  { %552 = vmatpush2.bf16.msra.mxu1 %v1514_v37 }
  0x50   :  { %553 = vmatprep.subr.bf16.mxu1 %v1515_v39 }
  0x51   :  { %895 = vmatpush2.bf16.msra.mxu0 %v1551_v1 }
  0x52   :  { %896 = vmatprep.subr.bf16.mxu0 %v1556_v2 }
  0x53   :  { %554 = vmatpush2.bf16.msra.mxu1 %v1517_v40 }
  0x54   :  { %1294 = vmatmul.mubr.msk.bf16.gmra.mxu0 %vm153_vm0, %v1474_v34  ;;  %555 = vmatprep.subr.bf16.mxu1 %v1518_v41 }
  0x55   :  { %280 = vmatprep.mubr.bf16.mxu0 %v1636_v0  ;;  %897 = vmatpush2.bf16.msra.mxu0 %v1554_v3 }
  0x56   :  { %898 = vmatprep.subr.bf16.mxu0 %v1559_v4 }
  0x57   :  { %556 = vmatpush2.bf16.msra.mxu1 %v1520_v42 }
  0x58   :  { %557 = vmatprep.subr.bf16.mxu1 %v1521_v43 }
  0x59   :  { %899 = vmatpush2.bf16.msra.mxu0 %v1557_v5 }
  0x5a   :  { %900 = vmatprep.subr.bf16.mxu0 %v1562_v6 }
  0x5b   :  { %558 = vmatpush2.bf16.msra.mxu1 %v1523_v44 }
  0x5c   :  { %1295 = vmatmul.mubr.msk.bf16.gmra.mxu0 %vm153_vm0, %v1475_v38 }
  0x5d   :  { %901 = vmatpush2.bf16.msra.mxu0 %v1560_v7 }
  0xe4   :  { %v212_v13 = vpop.f32.mrf.mxu0 }
  0xe5   :  { %v213_v19 = vadd.f32 %v212_v13, %v1753_v14 }
  0xe6   :  { %v214_v15 = vpop.f32.mrf.mxu0 }
  0xe7   :  { %v215_v21 = vadd.f32 %v214_v15, %v1756_v16 }
  0xe8   :  { %v216_v17 = vpop.f32.mrf.mxu0 }
  0xe9   :  { %v217_v18 = vadd.f32 %v216_v17, %v1753_v14 }
  0xea   :  { %v218_v20 = vpop.f32.mrf.mxu0 }
  0xeb   :  { %v219_v22 = vadd.f32 %v218_v20, %v1756_v16  ;;  %v291_v23 = vpack.c.bf16 %v217_v18, %v213_v19 }
  0xec   :  { %v222_v24 = vpop.f32.mrf.mxu0 }
  0xed   :  { %v292_v25 = vpack.c.bf16 %v219_v22, %v215_v21  ;;  %v307_v29 = vmax.bf16 %v1636_v0, %v291_v23  ;;  %v223_v31 = vadd.f32 %v222_v24, %v1753_v14 }
  0xee   :  { %v224_v26 = vpop.f32.mrf.mxu0 }
  0xef   :  { %v308_v27 = vmax.bf16 %v1636_v0, %v292_v25  ;;  %v225_v33 = vadd.f32 %v224_v26, %v1756_v16 }
  0xf0   :  { %v226_v28 = vpop.f32.mrf.mxu0 }
  0xf1   :  { %v227_v30 = vadd.f32 %v226_v28, %v1753_v14  ;;  %559 = vmatprep.mubr.bf16.mxu1 %v308_v27 }
  0xf2   :  { %v228_v32 = vpop.f32.mrf.mxu0  ;;  %560 = vmatmul.mubr.bf16.vlgmr.msra.gmra.mxu1 %v307_v29 }
  0xf3   :  { %v229_v34 = vadd.f32 %v228_v32, %v1756_v16  ;;  %v293_v35 = vpack.c.bf16 %v227_v30, %v223_v31 }
  0xf4   :  { %v232_v36 = vpop.f32.mrf.mxu0 }
  0xf5   :  { %v294_v37 = vpack.c.bf16 %v229_v34, %v225_v33  ;;  %v309_v41 = vmax.bf16 %v1636_v0, %v293_v35  ;;  %v233_v43 = vadd.f32 %v232_v36, %v1753_v14 }
  0xf6   :  { %v234_v38 = vpop.f32.mrf.mxu0 }
  0xf7   :  { %v310_v39 = vmax.bf16 %v1636_v0, %v294_v37  ;;  %v235_v45 = vadd.f32 %v234_v38, %v1756_v16 }
  0xf8   :  { %v236_v40 = vpop.f32.mrf.mxu0 }
  0xf9   :  { %v237_v42 = vadd.f32 %v236_v40, %v1753_v14  ;;  %569 = vmatprep.mubr.bf16.mxu1 %v310_v39 }
  0xfa   :  { %v238_v44 = vpop.f32.mrf.mxu0  ;;  %570 = vmatmul.mubr.bf16.gmra.mxu1 %v309_v41 }
  0xfb   :  { %v239_v46 = vadd.f32 %v238_v44, %v1756_v16  ;;  %v295_v47 = vpack.c.bf16 %v237_v42, %v233_v43 }
  0xfc   :  { %v242_v48 = vpop.f32.mrf.mxu0 }
  0xfd   :  { %v296_v49 = vpack.c.bf16 %v239_v46, %v235_v45  ;;  %v311_v53 = vmax.bf16 %v1636_v0, %v295_v47  ;;  %v243_v55 = vadd.f32 %v242_v48, %v1753_v14 }
  0xfe   :  { %v244_v50 = vpop.f32.mrf.mxu0 }
  0xff   :  { %v312_v51 = vmax.bf16 %v1636_v0, %v296_v49  ;;  %v245_v57 = vadd.f32 %v244_v50, %v1756_v16 }
 0x100   :  { %v246_v52 = vpop.f32.mrf.mxu0 }
 0x101   :  { %v247_v54 = vadd.f32 %v246_v52, %v1753_v14  ;;  %579 = vmatprep.mubr.bf16.mxu1 %v312_v51  ;;  %v1565_v52 = vld [vmem:[#allocation4 + $0xa4] ss:$8 sps:$4 sm:$0xff]  }
 0x102   :  { %v248_v56 = vpop.f32.mrf.mxu0  ;;  %580 = vmatmul.mubr.bf16.gmra.mxu1 %v311_v53  ;;  %v1563_v53 = vld [vmem:[#allocation4 + $0xa0] ss:$8 sps:$4 sm:$0xff]   ;;  %902 = vmatprep.subr.bf16.mxu0 %v1565_v52 }
 0x103   :  { %v249_v58 = vadd.f32 %v248_v56, %v1756_v16  ;;  %v297_v59 = vpack.c.bf16 %v247_v54, %v243_v55  ;;  %903 = vmatpush2.bf16.msra.mxu0 %v1563_v53  ;;  %v1568_v54 = vld [vmem:[#allocation4 + $0x94] ss:$8 sps:$4 sm:$0xff]   ;;  %v1571_v55 = vld [vmem:[#allocation4 + $0x84] ss:$8 sps:$4 sm:$0xff]   ;;  %v1569_v56 = vld [vmem:[#allocation4 + $0x80] ss:$8 sps:$4 sm:$0xff]  }
 0x104   :  { %v252_v60 = vpop.f32.mrf.mxu0  ;;  %904 = vmatprep.subr.bf16.mxu0 %v1568_v54 }
 0x105   :  { %v298_v61 = vpack.c.bf16 %v249_v58, %v245_v57  ;;  %v313_v2 = vmax.bf16 %v1636_v0, %v297_v59  ;;  %v253_v4 = vadd.f32 %v252_v60, %v1753_v14  ;;  %v1573_v57 = vld [vmem:[%s2064_s7 + $0x38] sm:$0xff]   ;;  %v1574_v58 = vld [vmem:[%s2064_s7 + $0x70] sm:$0xff]   ;;  %v1576_v60 = vld [vmem:[%s2064_s7 + $0x68] sm:$0xff]  }
 0x106   :  { %v254_v62 = vpop.f32.mrf.mxu0  ;;  %v1575_v59 = vld [vmem:[%s2064_s7 + $0x30] sm:$0xff]  }
 0x107   :  { %v314_v63 = vmax.bf16 %v1636_v0, %v298_v61  ;;  %v255_v6 = vadd.f32 %v254_v62, %v1756_v16  ;;  %v1577_v61 = vld [vmem:[%s2064_s7 + $0x28] sm:$0xff]   ;;  %v1578_v62 = vld [vmem:[%s2064_s7 + $0x60] sm:$0xff]  }
 0x108   :  { %v256_v1 = vpop.f32.mrf.mxu0 }
 0x109   :  { %v257_v3 = vadd.f32 %v256_v1, %v1753_v14  ;;  %589 = vmatprep.mubr.bf16.mxu1 %v314_v63  ;;  %v1579_v63 = vld [vmem:[%s2064_s7 + $0x20] sm:$0xff]   ;;  %v1580_v1 = vld [vmem:[%s2064_s7 + $0x58] sm:$0xff]  }
 0x10a   :  { %v258_v5 = vpop.f32.mrf.mxu0  ;;  %590 = vmatmul.mubr.bf16.gmra.mxu1 %v313_v2  ;;  %v1836_v2 = vld [vmem:[%s2064_s7 + $0x18] sm:$0xff]  }
 0x10b   :  { %v259_v7 = vadd.f32 %v258_v5, %v1756_v16  ;;  %v299_v8 = vpack.c.bf16 %v257_v3, %v253_v4  ;;  %v355_v3 = vld [vmem:[%s2061_s4] sm:$0x3] }
 0x10c   :  { %v262_v9 = vpop.f32.mrf.mxu0  ;;  %v1843_v5 = vrot.slane %v355_v3, %v1745_v10 }
 0x10d   :  { %v300_v11 = vpack.c.bf16 %v259_v7, %v255_v6  ;;  %v315_v18 = vmax.bf16 %v1636_v0, %v299_v8  ;;  %v263_v20 = vadd.f32 %v262_v9, %v1753_v14  ;;  %v1846_v7 = vrot.slane %v355_v3, %v1750_v12 }
 0x10e   :  { %v264_v13 = vpop.f32.mrf.mxu0 }
 0x10f   :  { %v316_v15 = vmax.bf16 %v1636_v0, %v300_v11  ;;  %v265_v22 = vadd.f32 %v264_v13, %v1756_v16 }
 0x110   :  { %v266_v17 = vpop.f32.mrf.mxu0 }
 0x111   :  { %v267_v19 = vadd.f32 %v266_v17, %v1753_v14  ;;  %599 = vmatprep.mubr.bf16.mxu1 %v316_v15 }
 0x112   :  { %v268_v21 = vpop.f32.mrf.mxu0  ;;  %600 = vmatmul.mubr.bf16.gmra.mxu1 %v315_v18 }
 0x113   :  { %v269_v23 = vadd.f32 %v268_v21, %v1756_v16  ;;  %v301_v24 = vpack.c.bf16 %v267_v19, %v263_v20 }
 0x114   :  { %v272_v25 = vpop.f32.mrf.mxu0 }
 0x115   :  { %v302_v26 = vpack.c.bf16 %v269_v23, %v265_v22  ;;  %v317_v30 = vmax.bf16 %v1636_v0, %v301_v24  ;;  %v273_v32 = vadd.f32 %v272_v25, %v1753_v14 }
 0x116   :  { %v274_v27 = vpop.f32.mrf.mxu0 }
 0x117   :  { %v318_v28 = vmax.bf16 %v1636_v0, %v302_v26  ;;  %v275_v34 = vadd.f32 %v274_v27, %v1756_v16 }
 0x118   :  { %v276_v29 = vpop.f32.mrf.mxu0 }
 0x119   :  { %v277_v31 = vadd.f32 %v276_v29, %v1753_v14  ;;  %609 = vmatprep.mubr.bf16.mxu1 %v318_v28 }
 0x11a   :  { %v278_v33 = vpop.f32.mrf.mxu0  ;;  %610 = vmatmul.mubr.bf16.gmra.mxu1 %v317_v30 }
 0x11b   :  { %v279_v35 = vadd.f32 %v278_v33, %v1756_v16  ;;  %v303_v36 = vpack.c.bf16 %v277_v31, %v273_v32 }
 0x11c   :  { %v282_v37 = vpop.f32.mrf.mxu0 }
 0x11d   :  { %v304_v38 = vpack.c.bf16 %v279_v35, %v275_v34  ;;  %v319_v42 = vmax.bf16 %v1636_v0, %v303_v36  ;;  %v283_v44 = vadd.f32 %v282_v37, %v1753_v14 }
 0x11e   :  { %v284_v39 = vpop.f32.mrf.mxu0 }
 0x11f   :  { %v320_v40 = vmax.bf16 %v1636_v0, %v304_v38  ;;  %v285_v46 = vadd.f32 %v284_v39, %v1756_v16 }
 0x120   :  { %v286_v41 = vpop.f32.mrf.mxu0 }
 0x121   :  { %v287_v43 = vadd.f32 %v286_v41, %v1753_v14  ;;  %619 = vmatprep.mubr.bf16.mxu1 %v320_v40  ;;  %v1566_v14 = vld [vmem:[#allocation4 + $0x90] ss:$8 sps:$4 sm:$0xff]  }
 0x122   :  { %v288_v45 = vpop.f32.mrf.mxu0  ;;  %620 = vmatmul.mubr.bf16.gmra.mxu1 %v319_v42  ;;  %905 = vmatpush2.bf16.msra.mxu0 %v1566_v14 }
 0x123   :  { %v289_v47 = vadd.f32 %v288_v45, %v1756_v16  ;;  %v305_v48 = vpack.c.bf16 %v287_v43, %v283_v44  ;;  %906 = vmatprep.subr.bf16.mxu0 %v1571_v55  ;;  %v1572_v16 = vld [vmem:[%s2064_s7 + $0x78] sm:$0xff]  }
 0x124   :  { %1441 = vmatprep.subr.bf16.mxu1 %v1572_v16 }
 0x125   :  { %v306_v49 = vpack.c.bf16 %v289_v47, %v285_v46  ;;  %v321_v51 = vmax.bf16 %v1636_v0, %v305_v48  ;;  %1449 = vmatpush3.bf16.msra.mxu1 %v1573_v57 }
 0x126   :  { %907 = vmatpush2.bf16.msra.mxu0 %v1569_v56  ;;  %1442 = vmatprep.subr.bf16.mxu1 %v1574_v58 }
 0x127   :  { %v322_v50 = vmax.bf16 %v1636_v0, %v306_v49  ;;  %1377 = vmatprep.subr.bf16.mxu0 %v1572_v16 }
 0x129   :  { %629 = vmatprep.mubr.bf16.mxu1 %v322_v50  ;;  %1450 = vmatpush3.bf16.msra.mxu1 %v1575_v59 }
 0x12a   :  { %630 = vmatmul.mubr.bf16.gmra.mxu1 %v321_v51  ;;  %1443 = vmatprep.subr.bf16.mxu1 %v1576_v60 }
 0x12d   :  { %1451 = vmatpush3.bf16.msra.mxu1 %v1577_v61 }
 0x12e   :  { %1444 = vmatprep.subr.bf16.mxu1 %v1578_v62 }
 0x131   :  { %1452 = vmatpush3.bf16.msra.mxu1 %v1579_v63 }
 0x132   :  { %1445 = vmatprep.subr.bf16.mxu1 %v1580_v1 }
 0x135   :  { %1453 = vmatpush3.bf16.msra.mxu1 %v1836_v2 }
 0x1b2   :  { %v561_v4 = vpop.f32.mrf.mxu1 }
 0x1b3   :  { %v562_v11 = vadd.f32 %v561_v4, %v1843_v5 }
 0x1b4   :  { %v563_v6 = vpop.f32.mrf.mxu1 }
 0x1b5   :  { %v564_v15 = vadd.f32 %v563_v6, %v1846_v7 }
 0x1b6   :  { %v565_v8 = vpop.f32.mrf.mxu1 }
 0x1b7   :  { %v566_v9 = vadd.f32 %v565_v8, %v1843_v5 }
 0x1b8   :  { %v567_v13 = vpop.f32.mrf.mxu1 }
 0x1b9   :  { %v568_v17 = vadd.f32 %v567_v13, %v1846_v7  ;;  %v640_v18 = vpack.c.bf16 %v566_v9, %v562_v11 }
 0x1ba   :  { %v571_v19 = vpop.f32.mrf.mxu1 }
 0x1bb   :  { %v641_v20 = vpack.c.bf16 %v568_v17, %v564_v15  ;;  %v656_v23 = vmax.bf16 %v1636_v0, %v640_v18  ;;  %v572_v26 = vadd.f32 %v571_v19, %v1843_v5 }
 0x1bc   :  { %v573_v21 = vpop.f32.mrf.mxu1 }
 0x1bd   :  { %v657_v22 = vmax.bf16 %v1636_v0, %v641_v20  ;;  %v574_v28 = vadd.f32 %v573_v21, %v1846_v7 }
 0x1be   :  { %v575_v24 = vpop.f32.mrf.mxu1 }
 0x1bf   :  { %v576_v25 = vadd.f32 %v575_v24, %v1843_v5  ;;  %908 = vmatprep.mubr.bf16.mxu0 %v657_v22 }
 0x1c0   :  { %v577_v27 = vpop.f32.mrf.mxu1  ;;  %909 = vmatmul.mubr.bf16.vlgmr.msra.gmra.mxu0 %v656_v23 }
 0x1c1   :  { %v578_v29 = vadd.f32 %v577_v27, %v1846_v7  ;;  %1378 = vmatpush3.bf16.msra.mxu0 %v1573_v57  ;;  %v642_v30 = vpack.c.bf16 %v576_v25, %v572_v26 }
 0x1c2   :  { %v581_v31 = vpop.f32.mrf.mxu1  ;;  %1379 = vmatprep.subr.bf16.mxu0 %v1574_v58 }
 0x1c3   :  { %v643_v32 = vpack.c.bf16 %v578_v29, %v574_v28  ;;  %v658_v36 = vmax.bf16 %v1636_v0, %v642_v30  ;;  %v582_v38 = vadd.f32 %v581_v31, %v1843_v5 }
 0x1c4   :  { %v583_v33 = vpop.f32.mrf.mxu1 }
 0x1c5   :  { %v659_v34 = vmax.bf16 %v1636_v0, %v643_v32  ;;  %1380 = vmatpush3.bf16.msra.mxu0 %v1575_v59  ;;  %v584_v40 = vadd.f32 %v583_v33, %v1846_v7 }
 0x1c6   :  { %v585_v35 = vpop.f32.mrf.mxu1  ;;  %1381 = vmatprep.subr.bf16.mxu0 %v1576_v60 }
 0x1c7   :  { %v586_v37 = vadd.f32 %v585_v35, %v1843_v5  ;;  %918 = vmatprep.mubr.bf16.mxu0 %v659_v34 }
 0x1c8   :  { %v587_v39 = vpop.f32.mrf.mxu1  ;;  %919 = vmatmul.mubr.bf16.gmra.mxu0 %v658_v36 }
 0x1c9   :  { %v588_v41 = vadd.f32 %v587_v39, %v1846_v7  ;;  %1382 = vmatpush3.bf16.msra.mxu0 %v1577_v61  ;;  %v644_v42 = vpack.c.bf16 %v586_v37, %v582_v38 }
 0x1ca   :  { %v591_v43 = vpop.f32.mrf.mxu1  ;;  %1383 = vmatprep.subr.bf16.mxu0 %v1578_v62 }
 0x1cb   :  { %v645_v44 = vpack.c.bf16 %v588_v41, %v584_v40  ;;  %v660_v48 = vmax.bf16 %v1636_v0, %v644_v42  ;;  %v592_v50 = vadd.f32 %v591_v43, %v1843_v5 }
 0x1cc   :  { %v593_v45 = vpop.f32.mrf.mxu1 }
 0x1cd   :  { %v661_v46 = vmax.bf16 %v1636_v0, %v645_v44  ;;  %1384 = vmatpush3.bf16.msra.mxu0 %v1579_v63  ;;  %v594_v52 = vadd.f32 %v593_v45, %v1846_v7 }
 0x1ce   :  { %v595_v47 = vpop.f32.mrf.mxu1  ;;  %1385 = vmatprep.subr.bf16.mxu0 %v1580_v1 }
 0x1cf   :  { %v596_v49 = vadd.f32 %v595_v47, %v1843_v5  ;;  %928 = vmatprep.mubr.bf16.mxu0 %v661_v46  ;;  %v1582_v47 = vld [vmem:[%s2064_s7 + $0x50] sm:$0xff]  }
 0x1d0   :  { %v597_v51 = vpop.f32.mrf.mxu1  ;;  %929 = vmatmul.mubr.bf16.gmra.mxu0 %v660_v48  ;;  %1446 = vmatprep.subr.bf16.mxu1 %v1582_v47  ;;  %v1585_v48 = vld [vmem:[%s2064_s7 + $0x8] sm:$0xff]  }
 0x1d1   :  { %v598_v53 = vadd.f32 %v597_v51, %v1846_v7  ;;  %1386 = vmatpush3.bf16.msra.mxu0 %v1836_v2  ;;  %v646_v54 = vpack.c.bf16 %v596_v49, %v592_v50  ;;  %v1586_v49 = vld [vmem:[%s2064_s7 + $0x40] sm:$0xff]  }
 0x1d2   :  { %v601_v14 = vpop.f32.mrf.mxu1  ;;  %1387 = vmatprep.subr.bf16.mxu0 %v1582_v47  ;;  %v1587_v50 = vld [vmem:[%s2064_s7] sm:$0xff]  }
 0x1d3   :  { %v647_v55 = vpack.c.bf16 %v598_v53, %v594_v52  ;;  %v662_v58 = vmax.bf16 %v1636_v0, %v646_v54  ;;  %v602_v60 = vadd.f32 %v601_v14, %v1843_v5  ;;  %v704_v51 = vld [vmem:[%s2063_s6] sm:$0x3] }
 0x1d4   :  { %v603_v56 = vpop.f32.mrf.mxu1  ;;  %v1919_v53 = vrot.slane %v704_v51, %v1745_v10  ;;  %v1922_v14 = vrot.slane %v704_v51, %v1750_v12 }
 0x1d5   :  { %v663_v16 = vmax.bf16 %v1636_v0, %v647_v55  ;;  %v604_v62 = vadd.f32 %v603_v56, %v1846_v7 }
 0x1d6   :  { %v605_v57 = vpop.f32.mrf.mxu1 }
 0x1d7   :  { %v606_v59 = vadd.f32 %v605_v57, %v1843_v5  ;;  %938 = vmatprep.mubr.bf16.mxu0 %v663_v16 }
 0x1d8   :  { %v607_v61 = vpop.f32.mrf.mxu1  ;;  %939 = vmatmul.mubr.bf16.gmra.mxu0 %v662_v58 }
 0x1d9   :  { %v608_v63 = vadd.f32 %v607_v61, %v1846_v7  ;;  %v648_v1 = vpack.c.bf16 %v606_v59, %v602_v60 }
 0x1da   :  { %v611_v2 = vpop.f32.mrf.mxu1 }
 0x1db   :  { %v649_v3 = vpack.c.bf16 %v608_v63, %v604_v62  ;;  %v664_v9 = vmax.bf16 %v1636_v0, %v648_v1  ;;  %v612_v13 = vadd.f32 %v611_v2, %v1843_v5 }
 0x1dc   :  { %v613_v4 = vpop.f32.mrf.mxu1 }
 0x1dd   :  { %v665_v6 = vmax.bf16 %v1636_v0, %v649_v3  ;;  %v614_v17 = vadd.f32 %v613_v4, %v1846_v7 }
 0x1de   :  { %v615_v8 = vpop.f32.mrf.mxu1 }
 0x1df   :  { %v616_v11 = vadd.f32 %v615_v8, %v1843_v5  ;;  %948 = vmatprep.mubr.bf16.mxu0 %v665_v6 }
 0x1e0   :  { %v617_v15 = vpop.f32.mrf.mxu1  ;;  %949 = vmatmul.mubr.bf16.gmra.mxu0 %v664_v9 }
 0x1e1   :  { %v618_v18 = vadd.f32 %v617_v15, %v1846_v7  ;;  %v650_v19 = vpack.c.bf16 %v616_v11, %v612_v13 }
 0x1e2   :  { %v621_v20 = vpop.f32.mrf.mxu1 }
 0x1e3   :  { %v651_v21 = vpack.c.bf16 %v618_v18, %v614_v17  ;;  %v666_v25 = vmax.bf16 %v1636_v0, %v650_v19  ;;  %v622_v27 = vadd.f32 %v621_v20, %v1843_v5 }
 0x1e4   :  { %v623_v22 = vpop.f32.mrf.mxu1 }
 0x1e5   :  { %v667_v23 = vmax.bf16 %v1636_v0, %v651_v21  ;;  %v624_v29 = vadd.f32 %v623_v22, %v1846_v7 }
 0x1e6   :  { %v625_v24 = vpop.f32.mrf.mxu1 }
 0x1e7   :  { %v626_v26 = vadd.f32 %v625_v24, %v1843_v5  ;;  %958 = vmatprep.mubr.bf16.mxu0 %v667_v23 }
 0x1e8   :  { %v627_v28 = vpop.f32.mrf.mxu1  ;;  %959 = vmatmul.mubr.bf16.gmra.mxu0 %v666_v25 }
 0x1e9   :  { %v628_v30 = vadd.f32 %v627_v28, %v1846_v7  ;;  %v652_v31 = vpack.c.bf16 %v626_v26, %v622_v27 }
 0x1ea   :  { %v631_v32 = vpop.f32.mrf.mxu1 }
 0x1eb   :  { %v653_v33 = vpack.c.bf16 %v628_v30, %v624_v29  ;;  %v668_v37 = vmax.bf16 %v1636_v0, %v652_v31  ;;  %v632_v39 = vadd.f32 %v631_v32, %v1843_v5 }
 0x1ec   :  { %v633_v34 = vpop.f32.mrf.mxu1 }
 0x1ed   :  { %v669_v35 = vmax.bf16 %v1636_v0, %v653_v33  ;;  %v634_v41 = vadd.f32 %v633_v34, %v1846_v7 }
 0x1ee   :  { %v635_v36 = vpop.f32.mrf.mxu1 }
 0x1ef   :  { %v636_v38 = vadd.f32 %v635_v36, %v1843_v5  ;;  %968 = vmatprep.mubr.bf16.mxu0 %v669_v35  ;;  %v1583_v5 = vld [vmem:[%s2064_s7 + $0x10] sm:$0xff]  }
 0x1f0   :  { %v637_v40 = vpop.f32.mrf.mxu1  ;;  %969 = vmatmul.mubr.bf16.gmra.mxu0 %v668_v37  ;;  %1454 = vmatpush3.bf16.msra.mxu1 %v1583_v5 }
 0x1f1   :  { %v638_v42 = vadd.f32 %v637_v40, %v1846_v7  ;;  %v654_v43 = vpack.c.bf16 %v636_v38, %v632_v39  ;;  %1388 = vmatpush3.bf16.msra.mxu0 %v1583_v5  ;;  %v1584_v7 = vld [vmem:[%s2064_s7 + $0x48] sm:$0xff]  }
 0x1f2   :  { %1389 = vmatprep.subr.bf16.mxu0 %v1584_v7  ;;  %1447 = vmatprep.subr.bf16.mxu1 %v1584_v7 }
 0x1f3   :  { %v655_v44 = vpack.c.bf16 %v638_v42, %v634_v41  ;;  %v670_v46 = vmax.bf16 %v1636_v0, %v654_v43 }
 0x1f4   :  { %1455 = vmatpush3.bf16.msra.mxu1 %v1585_v48 }
 0x1f5   :  { %v671_v45 = vmax.bf16 %v1636_v0, %v655_v44  ;;  %1390 = vmatpush3.bf16.msra.mxu0 %v1585_v48  ;;  %1448 = vmatprep.subr.bf16.mxu1 %v1586_v49 }
 0x1f6   :  { %1391 = vmatprep.subr.bf16.mxu0 %v1586_v49 }
 0x1f7   :  { %978 = vmatprep.mubr.bf16.mxu0 %v671_v45 }
 0x1f8   :  { %979 = vmatmul.mubr.bf16.gmra.mxu0 %v670_v46  ;;  %1456 = vmatpush3.bf16.msra.mxu1 %v1587_v50 }
 0x1f9   :  { %1392 = vmatpush3.bf16.msra.mxu0 %v1587_v50 }
 0x280   :  { %v910_v52 = vpop.f32.mrf.mxu0 }
 0x281   :  { %v911_v16 = vadd.f32 %v910_v52, %v1919_v53 }
 0x282   :  { %v912_v54 = vpop.f32.mrf.mxu0 }
 0x283   :  { %v913_v58 = vadd.f32 %v912_v54, %v1922_v14 }
 0x284   :  { %v914_v55 = vpop.f32.mrf.mxu0 }
 0x285   :  { %v915_v56 = vadd.f32 %v914_v55, %v1919_v53 }
 0x286   :  { %v916_v57 = vpop.f32.mrf.mxu0 }
 0x287   :  { %v917_v59 = vadd.f32 %v916_v57, %v1922_v14  ;;  %v989_v60 = vpack.c.bf16 %v915_v56, %v911_v16 }
 0x288   :  { %v920_v61 = vpop.f32.mrf.mxu0 }
 0x289   :  { %v990_v62 = vpack.c.bf16 %v917_v59, %v913_v58  ;;  %v1005_v1 = vmax.bf16 %v1636_v0, %v989_v60  ;;  %v921_v3 = vadd.f32 %v920_v61, %v1919_v53 }
 0x28a   :  { %v922_v63 = vpop.f32.mrf.mxu0 }
 0x28b   :  { %v1006_v10 = vmax.bf16 %v1636_v0, %v990_v62  ;;  %v923_v6 = vadd.f32 %v922_v63, %v1922_v14 }
 0x28c   :  { %v924_v12 = vpop.f32.mrf.mxu0 }
 0x28d   :  { %v925_v2 = vadd.f32 %v924_v12, %v1919_v53  ;;  %1188 = vmatprep.mubr.bf16.mxu0 %v1006_v10 }
 0x28e   :  { %v926_v4 = vpop.f32.mrf.mxu0  ;;  %1189 = vmatmul.mubr.bf16.vlgmr.msra.gmra.mxu0 %v1005_v1 }
 0x28f   :  { %v927_v8 = vadd.f32 %v926_v4, %v1922_v14  ;;  %v991_v9 = vpack.c.bf16 %v925_v2, %v921_v3 }
 0x290   :  { %v930_v11 = vpop.f32.mrf.mxu0 }
 0x291   :  { %v992_v13 = vpack.c.bf16 %v927_v8, %v923_v6  ;;  %v1007_v19 = vmax.bf16 %v1636_v0, %v991_v9  ;;  %v931_v21 = vadd.f32 %v930_v11, %v1919_v53 }
 0x292   :  { %v932_v15 = vpop.f32.mrf.mxu0 }
 0x293   :  { %v1008_v17 = vmax.bf16 %v1636_v0, %v992_v13  ;;  %v933_v23 = vadd.f32 %v932_v15, %v1922_v14 }
 0x294   :  { %v934_v18 = vpop.f32.mrf.mxu0 }
 0x295   :  { %v935_v20 = vadd.f32 %v934_v18, %v1919_v53  ;;  %1196 = vmatprep.mubr.bf16.mxu0 %v1008_v17 }
 0x296   :  { %v936_v22 = vpop.f32.mrf.mxu0  ;;  %1197 = vmatmul.mubr.bf16.gmra.mxu0 %v1007_v19 }
 0x297   :  { %v937_v24 = vadd.f32 %v936_v22, %v1922_v14  ;;  %v993_v25 = vpack.c.bf16 %v935_v20, %v931_v21 }
 0x298   :  { %v940_v26 = vpop.f32.mrf.mxu0 }
 0x299   :  { %v994_v27 = vpack.c.bf16 %v937_v24, %v933_v23  ;;  %v1009_v31 = vmax.bf16 %v1636_v0, %v993_v25  ;;  %v941_v33 = vadd.f32 %v940_v26, %v1919_v53 }
 0x29a   :  { %v942_v28 = vpop.f32.mrf.mxu0 }
 0x29b   :  { %v1010_v29 = vmax.bf16 %v1636_v0, %v994_v27  ;;  %v943_v35 = vadd.f32 %v942_v28, %v1922_v14 }
 0x29c   :  { %v944_v30 = vpop.f32.mrf.mxu0 }
 0x29d   :  { %v945_v32 = vadd.f32 %v944_v30, %v1919_v53  ;;  %1204 = vmatprep.mubr.bf16.mxu0 %v1010_v29  ;;  %v1975_v29 = vld [vmem:[%s2065_s8] ss:$0 sm:$0xff] }
 0x29e   :  { %v946_v34 = vpop.f32.mrf.mxu0  ;;  %1205 = vmatmul.mubr.bf16.gmra.mxu0 %v1009_v31 }
 0x29f   :  { %v947_v36 = vadd.f32 %v946_v34, %v1922_v14  ;;  %v995_v37 = vpack.c.bf16 %v945_v32, %v941_v33 }
 0x2a0   :  { %v950_v38 = vpop.f32.mrf.mxu0 }
 0x2a1   :  { %v996_v39 = vpack.c.bf16 %v947_v36, %v943_v35  ;;  %v1011_v42 = vmax.bf16 %v1636_v0, %v995_v37  ;;  %v951_v45 = vadd.f32 %v950_v38, %v1919_v53 }
 0x2a2   :  { %v952_v40 = vpop.f32.mrf.mxu0 }
 0x2a3   :  { %v1012_v41 = vmax.bf16 %v1636_v0, %v996_v39  ;;  %v953_v47 = vadd.f32 %v952_v40, %v1922_v14 }
 0x2a4   :  { %v954_v43 = vpop.f32.mrf.mxu0 }
 0x2a5   :  { %v955_v44 = vadd.f32 %v954_v43, %v1919_v53  ;;  %1212 = vmatprep.mubr.bf16.mxu1 %v1012_v41 }
 0x2a6   :  { %v956_v46 = vpop.f32.mrf.mxu0  ;;  %1213 = vmatmul.mubr.bf16.vlgmr.msra.gmra.mxu1 %v1011_v42 }
 0x2a7   :  { %v957_v5 = vadd.f32 %v956_v46, %v1922_v14  ;;  %v997_v7 = vpack.c.bf16 %v955_v44, %v951_v45 }
 0x2a8   :  { %v960_v48 = vpop.f32.mrf.mxu0 }
 0x2a9   :  { %v998_v49 = vpack.c.bf16 %v957_v5, %v953_v47  ;;  %v1013_v54 = vmax.bf16 %v1636_v0, %v997_v7  ;;  %v961_v56 = vadd.f32 %v960_v48, %v1919_v53 }
 0x2aa   :  { %v962_v50 = vpop.f32.mrf.mxu0 }
 0x2ab   :  { %v1014_v51 = vmax.bf16 %v1636_v0, %v998_v49  ;;  %v963_v57 = vadd.f32 %v962_v50, %v1922_v14 }
 0x2ac   :  { %v964_v52 = vpop.f32.mrf.mxu0 }
 0x2ad   :  { %v965_v55 = vadd.f32 %v964_v52, %v1919_v53  ;;  %1220 = vmatprep.mubr.bf16.mxu1 %v1014_v51 }
 0x2ae   :  { %v966_v16 = vpop.f32.mrf.mxu0  ;;  %1221 = vmatmul.mubr.bf16.gmra.mxu1 %v1013_v54 }
 0x2af   :  { %v967_v58 = vadd.f32 %v966_v16, %v1922_v14  ;;  %v999_v59 = vpack.c.bf16 %v965_v55, %v961_v56 }
 0x2b0   :  { %v970_v60 = vpop.f32.mrf.mxu0 }
 0x2b1   :  { %v1000_v61 = vpack.c.bf16 %v967_v58, %v963_v57  ;;  %v1015_v1 = vmax.bf16 %v1636_v0, %v999_v59  ;;  %v971_v2 = vadd.f32 %v970_v60, %v1919_v53 }
 0x2b2   :  { %v972_v62 = vpop.f32.mrf.mxu0 }
 0x2b3   :  { %v1016_v63 = vmax.bf16 %v1636_v0, %v1000_v61  ;;  %v973_v4 = vadd.f32 %v972_v62, %v1922_v14 }
 0x2b4   :  { %v974_v10 = vpop.f32.mrf.mxu0 }
 0x2b5   :  { %v975_v12 = vadd.f32 %v974_v10, %v1919_v53  ;;  %1228 = vmatprep.mubr.bf16.mxu1 %v1016_v63 }
 0x2b6   :  { %v976_v3 = vpop.f32.mrf.mxu0  ;;  %1229 = vmatmul.mubr.bf16.gmra.mxu1 %v1015_v1 }
 0x2b7   :  { %v977_v6 = vadd.f32 %v976_v3, %v1922_v14  ;;  %v1001_v8 = vpack.c.bf16 %v975_v12, %v971_v2 }
 0x2b8   :  { %v980_v9 = vpop.f32.mrf.mxu0 }
 0x2b9   :  { %v1002_v11 = vpack.c.bf16 %v977_v6, %v973_v4  ;;  %v1017_v18 = vmax.bf16 %v1636_v0, %v1001_v8  ;;  %v981_v20 = vadd.f32 %v980_v9, %v1919_v53 }
 0x2ba   :  { %v982_v13 = vpop.f32.mrf.mxu0 }
 0x2bb   :  { %v1018_v15 = vmax.bf16 %v1636_v0, %v1002_v11  ;;  %v983_v22 = vadd.f32 %v982_v13, %v1922_v14 }
 0x2bc   :  { %v984_v17 = vpop.f32.mrf.mxu0 }
 0x2bd   :  { %v985_v19 = vadd.f32 %v984_v17, %v1919_v53  ;;  %1236 = vmatprep.mubr.bf16.mxu1 %v1018_v15 }
 0x2be   :  { %v986_v21 = vpop.f32.mrf.mxu0  ;;  %1237 = vmatmul.mubr.bf16.gmra.mxu1 %v1017_v18 }
 0x2bf   :  { %v987_v23 = vadd.f32 %v986_v21, %v1922_v14  ;;  %v1003_v24 = vpack.c.bf16 %v985_v19, %v981_v20 }
 0x2c1   :  { %v1004_v25 = vpack.c.bf16 %v987_v23, %v983_v22  ;;  %v1019_v27 = vmax.bf16 %v1636_v0, %v1003_v24 }
 0x2c3   :  { %v1020_v26 = vmax.bf16 %v1636_v0, %v1004_v25 }
 0x2c5   :  { %1244 = vmatprep.mubr.bf16.mxu1 %v1020_v26 }
 0x2c6   :  { %1245 = vmatmul.mubr.bf16.gmra.mxu1 %v1019_v27 }
 0x34e   :  { %v1393_v28 = vpop.f32.mrf.mxu0 }
 0x350   :  { %v1394_v53 = vpop.f32.mrf.mxu0 }
 0x351   :  { %v1395_v30 = vadd.f32 %v1394_v53, %v1393_v28 }
 0x352   :  { %v1396_v31 = vpop.f32.mrf.mxu0 }
 0x353   :  { %v1191_v14 = vadd.f32 %v1395_v30, %v1975_v29 }
 0x354   :  { %v1397_v32 = vpop.f32.mrf.mxu0 }
 0x355   :  { %1254 = vst.msk [vmem:[%s2066_s9] sm:$0xff] %vm1253_vm1, %v1191_v14  ;;  %v1398_v0 = vadd.f32 %v1397_v32, %v1396_v31 }
 0x356   :  { %v1399_v33 = vpop.f32.mrf.mxu0 }
 0x357   :  { %v1194_v34 = vadd.f32 %v1398_v0, %v1975_v29 }
 0x358   :  { %v1400_v35 = vpop.f32.mrf.mxu0 }
 0x359   :  { %1255 = vst.msk [vmem:[%s2066_s9 + $0x8] sm:$0xff] %vm1253_vm1, %v1194_v34  ;;  %v1401_v36 = vadd.f32 %v1400_v35, %v1399_v33 }
 0x35a   :  { %v1402_v37 = vpop.f32.mrf.mxu0 }
 0x35b   :  { %v1199_v38 = vadd.f32 %v1401_v36, %v1975_v29 }
 0x35c   :  { %v1403_v39 = vpop.f32.mrf.mxu0 }
 0x35d   :  { %1256 = vst.msk [vmem:[%s2066_s9 + $0x10] sm:$0xff] %vm1253_vm1, %v1199_v38  ;;  %v1404_v40 = vadd.f32 %v1403_v39, %v1402_v37 }
 0x35e   :  { %v1405_v41 = vpop.f32.mrf.mxu0 }
 0x35f   :  { %v1202_v42 = vadd.f32 %v1404_v40, %v1975_v29 }
 0x360   :  { %v1406_v43 = vpop.f32.mrf.mxu0 }
 0x361   :  { %1257 = vst.msk [vmem:[%s2066_s9 + $0x18] sm:$0xff] %vm1253_vm1, %v1202_v42  ;;  %v1407_v44 = vadd.f32 %v1406_v43, %v1405_v41 }
 0x362   :  { %v1408_v45 = vpop.f32.mrf.mxu0 }
 0x363   :  { %v1207_v46 = vadd.f32 %v1407_v44, %v1975_v29 }
 0x364   :  { %v1409_v47 = vpop.f32.mrf.mxu0 }
 0x365   :  { %1258 = vst.msk [vmem:[%s2066_s9 + $0x20] sm:$0xff] %vm1253_vm1, %v1207_v46  ;;  %v1410_v5 = vadd.f32 %v1409_v47, %v1408_v45 }
 0x366   :  { %v1411_v7 = vpop.f32.mrf.mxu1 }
 0x367   :  { %v1210_v48 = vadd.f32 %v1410_v5, %v1975_v29 }
 0x368   :  { %v1412_v49 = vpop.f32.mrf.mxu1 }
 0x369   :  { %1259 = vst.msk [vmem:[%s2066_s9 + $0x28] sm:$0xff] %vm1253_vm1, %v1210_v48  ;;  %v1413_v50 = vadd.f32 %v1412_v49, %v1411_v7 }
 0x36a   :  { %v1414_v51 = vpop.f32.mrf.mxu1 }
 0x36b   :  { %v1215_v52 = vadd.f32 %v1413_v50, %v1975_v29 }
 0x36c   :  { %v1415_v54 = vpop.f32.mrf.mxu1 }
 0x36d   :  { %1260 = vst.msk [vmem:[%s2066_s9 + $0x30] sm:$0xff] %vm1253_vm1, %v1215_v52  ;;  %v1416_v55 = vadd.f32 %v1415_v54, %v1414_v51 }
 0x36e   :  { %v1417_v56 = vpop.f32.mrf.mxu1 }
 0x36f   :  { %v1218_v16 = vadd.f32 %v1416_v55, %v1975_v29 }
 0x370   :  { %v1418_v57 = vpop.f32.mrf.mxu1 }
 0x371   :  { %1261 = vst.msk [vmem:[%s2066_s9 + $0x38] sm:$0xff] %vm1253_vm1, %v1218_v16  ;;  %v1419_v58 = vadd.f32 %v1418_v57, %v1417_v56 }
 0x372   :  { %v1420_v59 = vpop.f32.mrf.mxu1 }
 0x373   :  { %v1223_v60 = vadd.f32 %v1419_v58, %v1975_v29 }
 0x374   :  { %v1421_v61 = vpop.f32.mrf.mxu1 }
 0x375   :  { %1262 = vst.msk [vmem:[%s2066_s9 + $0x40] sm:$0xff] %vm1253_vm1, %v1223_v60  ;;  %v1422_v62 = vadd.f32 %v1421_v61, %v1420_v59 }
 0x376   :  { %v1423_v63 = vpop.f32.mrf.mxu1 }
 0x377   :  { %v1226_v10 = vadd.f32 %v1422_v62, %v1975_v29 }
 0x378   :  { %v1424_v1 = vpop.f32.mrf.mxu1 }
 0x379   :  { %1263 = vst.msk [vmem:[%s2066_s9 + $0x48] sm:$0xff] %vm1253_vm1, %v1226_v10  ;;  %v1425_v12 = vadd.f32 %v1424_v1, %v1423_v63 }
 0x37a   :  { %v1426_v2 = vpop.f32.mrf.mxu1 }
 0x37b   :  { %v1231_v3 = vadd.f32 %v1425_v12, %v1975_v29 }
 0x37c   :  { %v1427_v4 = vpop.f32.mrf.mxu1 }
 0x37d   :  { %1264 = vst.msk [vmem:[%s2066_s9 + $0x50] sm:$0xff] %vm1253_vm1, %v1231_v3  ;;  %v1428_v6 = vadd.f32 %v1427_v4, %v1426_v2 }
 0x37e   :  { %v1429_v8 = vpop.f32.mrf.mxu1 }
 0x37f   :  { %v1234_v9 = vadd.f32 %v1428_v6, %v1975_v29 }
 0x380   :  { %v1430_v11 = vpop.f32.mrf.mxu1 }
 0x381   :  { %1265 = vst.msk [vmem:[%s2066_s9 + $0x58] sm:$0xff] %vm1253_vm1, %v1234_v9  ;;  %v1431_v13 = vadd.f32 %v1430_v11, %v1429_v8 }
 0x382   :  { %v1432_v15 = vpop.f32.mrf.mxu1 }
 0x383   :  { %v1239_v17 = vadd.f32 %v1431_v13, %v1975_v29 }
 0x384   :  { %v1433_v18 = vpop.f32.mrf.mxu1 }
 0x385   :  { %1266 = vst.msk [vmem:[%s2066_s9 + $0x60] sm:$0xff] %vm1253_vm1, %v1239_v17  ;;  %v1434_v19 = vadd.f32 %v1433_v18, %v1432_v15 }
 0x386   :  { %v1435_v20 = vpop.f32.mrf.mxu1 }
 0x387   :  { %v1242_v21 = vadd.f32 %v1434_v19, %v1975_v29 }
 0x388   :  { %v1436_v22 = vpop.f32.mrf.mxu1 }
 0x389   :  { %1267 = vst.msk [vmem:[%s2066_s9 + $0x68] sm:$0xff] %vm1253_vm1, %v1242_v21  ;;  %v1437_v23 = vadd.f32 %v1436_v22, %v1435_v20 }
 0x38a   :  { %v1438_v24 = vpop.f32.mrf.mxu1 }
 0x38b   :  { %v1247_v25 = vadd.f32 %v1437_v23, %v1975_v29 }
 0x38c   :  { %v1439_v26 = vpop.f32.mrf.mxu1 }
 0x38d   :  { %1268 = vst.msk [vmem:[%s2066_s9 + $0x70] sm:$0xff] %vm1253_vm1, %v1247_v25  ;;  %v1440_v27 = vadd.f32 %v1439_v26, %v1438_v24 }
 0x38f   :  { %v1250_v28 = vadd.f32 %v1440_v27, %v1975_v29 }
 0x391   :  { %1269 = vst.msk [vmem:[%s2066_s9 + $0x78] sm:$0xff] %vm1253_vm1, %v1250_v28 }
 0x392   :  { %1274 = vsyncpa [#allocation3], 1 }
 0x393   :  { %1275 = vsyncpa [#allocation5], 1 }

</bundles_post_ra>
